<compile_context>
chip_gen: v7x
topology: tpu7x:2x2x1
jax: 0.10.0
libtpu: 0.0.40
codegen_flags: <defaults>
</compile_context>

<pallas_src>
import functools

import jax
import jax.numpy as jnp
from jax.experimental import pallas as pl
from jax.experimental.pallas import tpu as pltpu


DIMS = (176, 200, 100, 50, 10, 2)            # logical (PyTorch) layer sizes
PADDED_DIMS = (176, 256, 128, 128, 128, 128) # lane-friendly padded sizes


def _round_up(n: int, m: int) -> int:
    return ((n + m - 1) // m) * m


def _mlp_kernel(x_ref,
                w1_ref, b1_ref, w2_ref, b2_ref, w3_ref, b3_ref,
                w4_ref, b4_ref, w5_ref, b5_ref,
                o_ref, *, epilogue_dtype):
    def layer(h, w_ref, b_ref, relu):
        # bf16 operands on the MXU, f32 accumulation (cast rides idle VPU slots).
        acc = jnp.dot(h.astype(w_ref.dtype), w_ref[...],
                      preferred_element_type=jnp.float32)
        # Bias add / ReLU in epilogue_dtype: bf16 on v6e/v7x, f32 on v5e.
        h = acc.astype(epilogue_dtype) + b_ref[...].astype(epilogue_dtype)
        return jnp.maximum(h, 0) if relu else h

    h = x_ref[...]                        # f32 batch tile straight from HBM
    h = layer(h, w1_ref, b1_ref, True)
    h = layer(h, w2_ref, b2_ref, True)
    h = layer(h, w3_ref, b3_ref, True)
    h = layer(h, w4_ref, b4_ref, True)
    h = layer(h, w5_ref, b5_ref, False)
    o_ref[...] = h.astype(o_ref.dtype)    # bf16, lane-dense 128-wide store


def default_epilogue_dtype():
    """bf16 epilogue where the VPU supports it (v6e/v7x); f32 elsewhere (v5e)."""
    try:
        kind = jax.devices()[0].device_kind.lower()
    except Exception:
        return jnp.float32
    return jnp.bfloat16 if ("v6" in kind or "v7" in kind) else jnp.float32


def init_params(key):
    """Deterministic init matching nn.Linear shapes (Kaiming-uniform-like).

    Returns unpadded f32 params: W (in, out), b (1, out)."""
    params = []
    for i in range(len(DIMS) - 1):
        fan_in, fan_out = DIMS[i], DIMS[i + 1]
        key, kw, kb = jax.random.split(key, 3)
        bound = 1.0 / jnp.sqrt(fan_in)
        w = jax.random.uniform(kw, (fan_in, fan_out), jnp.float32, -bound, bound)
        b = jax.random.uniform(kb, (1, fan_out), jnp.float32, -bound, bound)
        params.append((w, b))
    return params


def prepare_params(params, weight_dtype=jnp.bfloat16):
    """One-time wrapper-side prep: zero-pad to lane-friendly dims, cast weights
    to bf16 (biases stay f32; the kernel casts them to the epilogue dtype)."""
    prepared = []
    for i, (w, b) in enumerate(params):
        in_pad, out_pad = PADDED_DIMS[i], PADDED_DIMS[i + 1]
        wp = jnp.zeros((in_pad, out_pad), weight_dtype)
        wp = wp.at[:w.shape[0], :w.shape[1]].set(w.astype(weight_dtype))
        bp = jnp.zeros((1, out_pad), jnp.float32)
        bp = bp.at[:, :b.shape[1]].set(b.astype(jnp.float32))
        prepared.append((wp, bp))
    return prepared


def _choose_tile_b(B, desired):
    b8 = _round_up(max(B, 1), 8)
    if b8 <= 8:
        return 8
    # Keep >=2 grid steps so the "parallel" axis can feed both TCs on v7x.
    tile = min(desired, _round_up(-(-b8 // 2), 8))
    tile = max(8, tile)
    # Shrink while last-block zero padding would waste more than ~12.5% of rows.
    while tile > 8 and (_round_up(B, tile) - B) * 8 > B:
        tile = max(8, _round_up(tile // 2, 8))
    return tile


def mlp_forward_padded(x, prepared_params, *, tile_b=512, epilogue_dtype=None):
    """x: (B, 176) float32.  Returns the raw padded (b_pad, 128) bf16 output
    buffer (no wrapper slice pass); real logits live in [:B, :2]."""
    B, fin = x.shape
    if epilogue_dtype is None:
        epilogue_dtype = default_epilogue_dtype()

    tile_b = _choose_tile_b(B, tile_b)
    b_pad = _round_up(B, tile_b)
    if b_pad != B:
        x = jnp.pad(x, ((0, b_pad - B), (0, 0)))

    flat = [x]
    in_specs = [pl.BlockSpec((tile_b, fin), lambda i: (i, 0))]
    for w, b in prepared_params:
        flat.append(w)
        in_specs.append(pl.BlockSpec(w.shape, lambda i: (0, 0)))  # VMEM resident
        flat.append(b)
        in_specs.append(pl.BlockSpec(b.shape, lambda i: (0, 0)))  # VMEM resident

    out_pad = prepared_params[-1][0].shape[1]   # 128: lane-dense output stores

    return pl.pallas_call(
        functools.partial(_mlp_kernel, epilogue_dtype=epilogue_dtype),
        out_shape=jax.ShapeDtypeStruct((b_pad, out_pad), jnp.bfloat16),
        grid=(b_pad // tile_b,),
        in_specs=in_specs,
        out_specs=pl.BlockSpec((tile_b, out_pad), lambda i: (i, 0)),
        compiler_params=pltpu.CompilerParams(
            dimension_semantics=("parallel",),   # shard batch tiles across TCs
        ),
    )(*flat)


def mlp_forward(x, prepared_params, *, tile_b=512, epilogue_dtype=None):
    """Module-equivalent forward: (B, 176) f32 -> (B, 2) f32."""
    out = mlp_forward_padded(x, prepared_params, tile_b=tile_b,
                             epilogue_dtype=epilogue_dtype)
    return out[:x.shape[0], :DIMS[-1]].astype(jnp.float32)


def mlp_reference_f32(x, params):
    """Pure f32 reference (matches the PyTorch module semantics)."""
    h = x
    for i, (w, b) in enumerate(params):
        h = h @ w + b
        if i < len(params) - 1:
            h = jnp.maximum(h, 0.0)
    return h


def mlp_reference_matched(x, params, *, weight_dtype=jnp.bfloat16,
                          epilogue_dtype=jnp.float32):
    """Reference mirroring the kernel's math: bf16 MXU operands, f32 accumulation,
    epilogue in epilogue_dtype, bf16 output store."""
    h = x
    for i, (w, b) in enumerate(params):
        acc = jnp.dot(h.astype(weight_dtype), w.astype(weight_dtype),
                      preferred_element_type=jnp.float32)
        h = acc.astype(epilogue_dtype) + b.astype(epilogue_dtype)
        if i < len(params) - 1:
            h = jnp.maximum(h, 0)
    return h.astype(jnp.bfloat16).astype(jnp.float32)


if __name__ == "__main__":
    key = jax.random.PRNGKey(0)
    key, kx = jax.random.split(key)
    batch = 8
    x = jax.random.normal(kx, (batch, 176), jnp.float32)

    params = init_params(key)
    prepared = prepare_params(params)
    edtype = default_epilogue_dtype()

    out = mlp_forward(x, prepared, epilogue_dtype=edtype)
    out = jax.block_until_ready(out)
    assert out.shape == (batch, 2), out.shape

    # Tight check vs a reference mirroring the kernel's bf16/f32 math.
    ref_matched = mlp_reference_matched(x, params, epilogue_dtype=edtype)
    tol = 1e-2 if edtype == jnp.float32 else 3e-2
    assert jnp.allclose(out, ref_matched, atol=tol, rtol=tol), \
        "mismatch vs matched (bf16) reference"

    # Loose sanity check vs the full-f32 PyTorch-equivalent reference
    # (difference is purely bf16 rounding of x / weights / epilogue / output).
    ref_f32 = mlp_reference_f32(x, params)
    assert jnp.allclose(out, ref_f32, atol=1e-1, rtol=1e-1), \
        "mismatch vs f32 reference beyond bf16 rounding tolerance"

    print("KERNEL_OK")
</pallas_src>

<mosaic_0001>
module attributes {stable_mosaic.version = 11 : i64} {
  func.func @_mlp_kernel(%arg0: i32, %arg1: memref<8x176xf32, #tpu.memory_space<vmem>>, %arg2: memref<176x256xbf16, #tpu.memory_space<vmem>>, %arg3: memref<1x256xf32, #tpu.memory_space<vmem>>, %arg4: memref<256x128xbf16, #tpu.memory_space<vmem>>, %arg5: memref<1x128xf32, #tpu.memory_space<vmem>>, %arg6: memref<128x128xbf16, #tpu.memory_space<vmem>>, %arg7: memref<1x128xf32, #tpu.memory_space<vmem>>, %arg8: memref<128x128xbf16, #tpu.memory_space<vmem>>, %arg9: memref<1x128xf32, #tpu.memory_space<vmem>>, %arg10: memref<128x128xbf16, #tpu.memory_space<vmem>>, %arg11: memref<1x128xf32, #tpu.memory_space<vmem>>, %arg12: memref<8x128xbf16, #tpu.memory_space<vmem>>) attributes {dimension_semantics = [#tpu.dimension_semantics<parallel>], iteration_bounds = array<i64: 1>, scalar_prefetch = 0 : i64, scratch_operands = 0 : i64, tpu.core_type = #tpu.core_type<tc>, window_params = [{transform_indices = @transform_0, window_bounds = array<i64: 8, 176>}, {pipeline_mode = #tpu.pipeline_mode<synchronous>, transform_indices = @transform_1, window_bounds = array<i64: 176, 256>}, {pipeline_mode = #tpu.pipeline_mode<synchronous>, transform_indices = @transform_2, window_bounds = array<i64: 1, 256>}, {pipeline_mode = #tpu.pipeline_mode<synchronous>, transform_indices = @transform_3, window_bounds = array<i64: 256, 128>}, {pipeline_mode = #tpu.pipeline_mode<synchronous>, transform_indices = @transform_4, window_bounds = array<i64: 1, 128>}, {pipeline_mode = #tpu.pipeline_mode<synchronous>, transform_indices = @transform_5, window_bounds = array<i64: 128, 128>}, {pipeline_mode = #tpu.pipeline_mode<synchronous>, transform_indices = @transform_6, window_bounds = array<i64: 1, 128>}, {pipeline_mode = #tpu.pipeline_mode<synchronous>, transform_indices = @transform_7, window_bounds = array<i64: 128, 128>}, {pipeline_mode = #tpu.pipeline_mode<synchronous>, transform_indices = @transform_8, window_bounds = array<i64: 1, 128>}, {pipeline_mode = #tpu.pipeline_mode<synchronous>, transform_indices = @transform_9, window_bounds = array<i64: 128, 128>}, {pipeline_mode = #tpu.pipeline_mode<synchronous>, transform_indices = @transform_10, window_bounds = array<i64: 1, 128>}, {transform_indices = @transform_11, window_bounds = array<i64: 8, 128>}]} {
    %c0 = arith.constant 0 : index
    %c0_0 = arith.constant 0 : index
    %0 = vector.load %arg1[%c0, %c0_0] : memref<8x176xf32, #tpu.memory_space<vmem>>, vector<8x176xf32>
    %1 = arith.truncf %0 : vector<8x176xf32> to vector<8x176xbf16>
    %c0_1 = arith.constant 0 : index
    %c0_2 = arith.constant 0 : index
    %2 = vector.load %arg2[%c0_1, %c0_2] : memref<176x256xbf16, #tpu.memory_space<vmem>>, vector<176x256xbf16>
    %cst = arith.constant dense<0.000000e+00> : vector<8x256xf32>
    %3 = tpu.matmul %1, %2, %cst {dimension_numbers = #tpu.dot_dimension_numbers<[1], [0], [0], [1], [0, 0, 1, 1], [], []>} : vector<8x176xbf16>, vector<176x256xbf16>, vector<8x256xf32> -> vector<8x256xf32>
    %c0_3 = arith.constant 0 : index
    %c0_4 = arith.constant 0 : index
    %4 = vector.load %arg3[%c0_3, %c0_4] : memref<1x256xf32, #tpu.memory_space<vmem>>, vector<1x256xf32>
    %5 = vector.broadcast %4 : vector<1x256xf32> to vector<8x256xf32>
    %6 = arith.addf %3, %5 : vector<8x256xf32>
    %cst_5 = arith.constant 0.000000e+00 : f32
    %7 = vector.broadcast %cst_5 : f32 to vector<8x256xf32>
    %8 = arith.maximumf %6, %7 : vector<8x256xf32>
    %9 = arith.truncf %8 : vector<8x256xf32> to vector<8x256xbf16>
    %c0_6 = arith.constant 0 : index
    %c0_7 = arith.constant 0 : index
    %10 = vector.load %arg4[%c0_6, %c0_7] : memref<256x128xbf16, #tpu.memory_space<vmem>>, vector<256x128xbf16>
    %cst_8 = arith.constant dense<0.000000e+00> : vector<8x128xf32>
    %11 = tpu.matmul %9, %10, %cst_8 {dimension_numbers = #tpu.dot_dimension_numbers<[1], [0], [0], [1], [0, 0, 1, 1], [], []>} : vector<8x256xbf16>, vector<256x128xbf16>, vector<8x128xf32> -> vector<8x128xf32>
    %c0_9 = arith.constant 0 : index
    %c0_10 = arith.constant 0 : index
    %12 = vector.load %arg5[%c0_9, %c0_10] : memref<1x128xf32, #tpu.memory_space<vmem>>, vector<1x128xf32>
    %13 = vector.broadcast %12 : vector<1x128xf32> to vector<8x128xf32>
    %14 = arith.addf %11, %13 : vector<8x128xf32>
    %cst_11 = arith.constant 0.000000e+00 : f32
    %15 = vector.broadcast %cst_11 : f32 to vector<8x128xf32>
    %16 = arith.maximumf %14, %15 : vector<8x128xf32>
    %17 = arith.truncf %16 : vector<8x128xf32> to vector<8x128xbf16>
    %c0_12 = arith.constant 0 : index
    %c0_13 = arith.constant 0 : index
    %18 = vector.load %arg6[%c0_12, %c0_13] : memref<128x128xbf16, #tpu.memory_space<vmem>>, vector<128x128xbf16>
    %cst_14 = arith.constant dense<0.000000e+00> : vector<8x128xf32>
    %19 = tpu.matmul %17, %18, %cst_14 {dimension_numbers = #tpu.dot_dimension_numbers<[1], [0], [0], [1], [0, 0, 1, 1], [], []>} : vector<8x128xbf16>, vector<128x128xbf16>, vector<8x128xf32> -> vector<8x128xf32>
    %c0_15 = arith.constant 0 : index
    %c0_16 = arith.constant 0 : index
    %20 = vector.load %arg7[%c0_15, %c0_16] : memref<1x128xf32, #tpu.memory_space<vmem>>, vector<1x128xf32>
    %21 = vector.broadcast %20 : vector<1x128xf32> to vector<8x128xf32>
    %22 = arith.addf %19, %21 : vector<8x128xf32>
    %cst_17 = arith.constant 0.000000e+00 : f32
    %23 = vector.broadcast %cst_17 : f32 to vector<8x128xf32>
    %24 = arith.maximumf %22, %23 : vector<8x128xf32>
    %25 = arith.truncf %24 : vector<8x128xf32> to vector<8x128xbf16>
    %c0_18 = arith.constant 0 : index
    %c0_19 = arith.constant 0 : index
    %26 = vector.load %arg8[%c0_18, %c0_19] : memref<128x128xbf16, #tpu.memory_space<vmem>>, vector<128x128xbf16>
    %cst_20 = arith.constant dense<0.000000e+00> : vector<8x128xf32>
    %27 = tpu.matmul %25, %26, %cst_20 {dimension_numbers = #tpu.dot_dimension_numbers<[1], [0], [0], [1], [0, 0, 1, 1], [], []>} : vector<8x128xbf16>, vector<128x128xbf16>, vector<8x128xf32> -> vector<8x128xf32>
    %c0_21 = arith.constant 0 : index
    %c0_22 = arith.constant 0 : index
    %28 = vector.load %arg9[%c0_21, %c0_22] : memref<1x128xf32, #tpu.memory_space<vmem>>, vector<1x128xf32>
    %29 = vector.broadcast %28 : vector<1x128xf32> to vector<8x128xf32>
    %30 = arith.addf %27, %29 : vector<8x128xf32>
    %cst_23 = arith.constant 0.000000e+00 : f32
    %31 = vector.broadcast %cst_23 : f32 to vector<8x128xf32>
    %32 = arith.maximumf %30, %31 : vector<8x128xf32>
    %33 = arith.truncf %32 : vector<8x128xf32> to vector<8x128xbf16>
    %c0_24 = arith.constant 0 : index
    %c0_25 = arith.constant 0 : index
    %34 = vector.load %arg10[%c0_24, %c0_25] : memref<128x128xbf16, #tpu.memory_space<vmem>>, vector<128x128xbf16>
    %cst_26 = arith.constant dense<0.000000e+00> : vector<8x128xf32>
    %35 = tpu.matmul %33, %34, %cst_26 {dimension_numbers = #tpu.dot_dimension_numbers<[1], [0], [0], [1], [0, 0, 1, 1], [], []>} : vector<8x128xbf16>, vector<128x128xbf16>, vector<8x128xf32> -> vector<8x128xf32>
    %c0_27 = arith.constant 0 : index
    %c0_28 = arith.constant 0 : index
    %36 = vector.load %arg11[%c0_27, %c0_28] : memref<1x128xf32, #tpu.memory_space<vmem>>, vector<1x128xf32>
    %37 = vector.broadcast %36 : vector<1x128xf32> to vector<8x128xf32>
    %38 = arith.addf %35, %37 : vector<8x128xf32>
    %39 = arith.truncf %38 : vector<8x128xf32> to vector<8x128xbf16>
    %c0_29 = arith.constant 0 : index
    %c0_30 = arith.constant 0 : index
    %40 = vector.load %arg12[%c0_29, %c0_30] : memref<8x128xbf16, #tpu.memory_space<vmem>>, vector<8x128xbf16>
    tpu.vector_store %arg12[%c0_29, %c0_30], %39 {strides = array<i32>} : memref<8x128xbf16, #tpu.memory_space<vmem>>, vector<8x128xbf16>,
    return
  }
  func.func @transform_0(%arg0: i32) -> (i32, i32) {
    %c0_i32 = arith.constant 0 : i32
    %c0_i32_0 = arith.constant 0 : i32
    return %arg0, %c0_i32 : i32, i32
  }
  func.func @transform_1(%arg0: i32) -> (i32, i32) {
    %c0_i32 = arith.constant 0 : i32
    %c0_i32_0 = arith.constant 0 : i32
    %c0_i32_1 = arith.constant 0 : i32
    return %c0_i32, %c0_i32_0 : i32, i32
  }
  func.func @transform_2(%arg0: i32) -> (i32, i32) {
    %c0_i32 = arith.constant 0 : i32
    %c0_i32_0 = arith.constant 0 : i32
    %c0_i32_1 = arith.constant 0 : i32
    return %c0_i32, %c0_i32_0 : i32, i32
  }
  func.func @transform_3(%arg0: i32) -> (i32, i32) {
    %c0_i32 = arith.constant 0 : i32
    %c0_i32_0 = arith.constant 0 : i32
    %c0_i32_1 = arith.constant 0 : i32
    return %c0_i32, %c0_i32_0 : i32, i32
  }
  func.func @transform_4(%arg0: i32) -> (i32, i32) {
    %c0_i32 = arith.constant 0 : i32
    %c0_i32_0 = arith.constant 0 : i32
    %c0_i32_1 = arith.constant 0 : i32
    return %c0_i32, %c0_i32_0 : i32, i32
  }
  func.func @transform_5(%arg0: i32) -> (i32, i32) {
    %c0_i32 = arith.constant 0 : i32
    %c0_i32_0 = arith.constant 0 : i32
    %c0_i32_1 = arith.constant 0 : i32
    return %c0_i32, %c0_i32_0 : i32, i32
  }
  func.func @transform_6(%arg0: i32) -> (i32, i32) {
    %c0_i32 = arith.constant 0 : i32
    %c0_i32_0 = arith.constant 0 : i32
    %c0_i32_1 = arith.constant 0 : i32
    return %c0_i32, %c0_i32_0 : i32, i32
  }
  func.func @transform_7(%arg0: i32) -> (i32, i32) {
    %c0_i32 = arith.constant 0 : i32
    %c0_i32_0 = arith.constant 0 : i32
    %c0_i32_1 = arith.constant 0 : i32
    return %c0_i32, %c0_i32_0 : i32, i32
  }
  func.func @transform_8(%arg0: i32) -> (i32, i32) {
    %c0_i32 = arith.constant 0 : i32
    %c0_i32_0 = arith.constant 0 : i32
    %c0_i32_1 = arith.constant 0 : i32
    return %c0_i32, %c0_i32_0 : i32, i32
  }
  func.func @transform_9(%arg0: i32) -> (i32, i32) {
    %c0_i32 = arith.constant 0 : i32
    %c0_i32_0 = arith.constant 0 : i32
    %c0_i32_1 = arith.constant 0 : i32
    return %c0_i32, %c0_i32_0 : i32, i32
  }
  func.func @transform_10(%arg0: i32) -> (i32, i32) {
    %c0_i32 = arith.constant 0 : i32
    %c0_i32_0 = arith.constant 0 : i32
    %c0_i32_1 = arith.constant 0 : i32
    return %c0_i32, %c0_i32_0 : i32, i32
  }
  func.func @transform_11(%arg0: i32) -> (i32, i32) {
    %c0_i32 = arith.constant 0 : i32
    %c0_i32_0 = arith.constant 0 : i32
    return %arg0, %c0_i32 : i32, i32
  }
}

</mosaic_0001>

<bundles_post_ra>
// kernel: tpu_custom_call.1
= control target key start
LH: loop header
LB: loop body
LE: loop exit
PB: predicated region body
PF: predicated region fallthrough
CT: control target
= control target key end

     0   :  { %16 = vsyncpa [#allocation3], 0  ;;  %s1491_s0 = inlined_call_operand.hbm [shape: f32[8,176], index: 0, kind: input, shape index: {}]   ;;  %s1492_s1 = inlined_call_operand.hbm [shape: bf16[176,256], index: 1, kind: input, shape index: {}]   ;;  %s1493_s2 = inlined_call_operand.vmem [shape: f32[1,256], index: 2, kind: input, shape index: {}]   ;;  %s1494_s3 = inlined_call_operand.hbm [shape: bf16[256,128], index: 3, kind: input, shape index: {}]   ;;  %s1495_s4 = inlined_call_operand.vmem [shape: f32[1,128], index: 4, kind: input, shape index: {}]   ;;  %s1496_s5 = inlined_call_operand.hbm [shape: bf16[128,128], index: 5, kind: input, shape index: {}]   ;;  %s1497_s6 = inlined_call_operand.vmem [shape: f32[1,128], index: 6, kind: input, shape index: {}]   ;;  %s1498_s7 = inlined_call_operand.hbm [shape: bf16[128,128], index: 7, kind: input, shape index: {}]   ;;  %s1499_s8 = inlined_call_operand.vmem [shape: f32[1,128], index: 8, kind: input, shape index: {}]   ;;  %s1500_s9 = inlined_call_operand.hbm [shape: bf16[128,128], index: 9, kind: input, shape index: {}]   ;;  %s1501_s10 = inlined_call_operand.vmem [shape: f32[1,128], index: 10, kind: input, shape index: {}]   ;;  %s1502_s11 = inlined_call_operand.hbm [shape: bf16[8,128], index: 11, kind: output, shape index: {}]  }
   0x1   :  { %17 = vsyncpa [#allocation6], 0 }
   0x2   :  { %18 = vsyncpa [#allocation9], 0 }
   0x3   :  { %19 = vsyncpa [#allocation12], 0 }
   0x4   :  { %20 = vsyncpa [#allocation4], 0  ;;  %s1277_s17 = smov [#allocation5]   ;;  %s1113_s21 = scalar_lea.hbm %s1492_s1, 2816 }
   0x5   :  { %s36_s18 = sshll.u32 %s1277_s17, 4  ;;  %p1114_p0 = scmp.ne.s32.totalorder %s1492_s1, %s1113_s21  ;;  %s37_s18 = int_to_ptr.vmem [resolvable:$true] %s36_s18 }
   0x6   :  { %p1117_p1 = scmp.lt.u32.totalorder %s1113_s21, %s1492_s1 }
   0x8   :  { %p1119_p2 = pnand %p1117_p1, %p1114_p0 }
   0xa   :  { %1122 = shalt.err (!%p1119_p2)
}
   0xb   :  { %s1123_s26 = scalar_lea.vmem %s37_s18, 2816  ;;  %p1128_p4 = scmp.lt.s32.totalorder %s37_s18, %s37_s18 }
   0xc   :  { %p1124_p3 = scmp.ne.s32.totalorder %s37_s18, %s1123_s26  ;;  %p1129_p5 = scmp.lt.s32.totalorder %s1123_s26, %s1123_s26 }
   0xe   :  { %p1130_p6 = por %p1129_p5, %p1128_p4 }
  0x10   :  { %p1131_p7 = pnand %p1130_p6, %p1124_p3 }
  0x12   :  { %1134 = shalt.err (!%p1131_p7)
}
  0x13   :  { %s1278_s27 = smov 128   ;;  %s1279_s28 = smov 8  }
  0x14   :  { %42 = dma.hbm_to_vmem [thread:$0]  %s1492_s1, 2816, %s37_s18, [#allocation6], %s1278_s27, %s1278_s27, %s1279_s28  }
  0x15   :  { %s1280_s12 = smov [#allocation8]   ;;  %s1281_s14 = smov [#allocation2]  }
  0x16   :  { %s64_s13 = sshll.u32 %s1280_s12, 4  ;;  %s27_s15 = sshll.u32 %s1281_s14, 4  ;;  %s65_s13 = int_to_ptr.vmem [resolvable:$true] %s64_s13  ;;  %s28_s15 = int_to_ptr.vmem [resolvable:$true] %s27_s15 }
  0x17   :  { %s1135_s19 = scalar_lea.hbm %s1496_s5, 1024 }
  0x18   :  { %p1136_p8 = scmp.ne.s32.totalorder %s1496_s5, %s1135_s19  ;;  %p1139_p9 = scmp.lt.u32.totalorder %s1135_s19, %s1496_s5 }
  0x1a   :  { %p1141_p10 = pnand %p1139_p9, %p1136_p8 }
  0x1c   :  { %1144 = shalt.err (!%p1141_p10)
}
  0x1d   :  { %s1145_s1 = scalar_lea.vmem %s65_s13, 1024  ;;  %p1150_p12 = scmp.lt.s32.totalorder %s65_s13, %s65_s13 }
  0x1e   :  { %p1146_p11 = scmp.ne.s32.totalorder %s65_s13, %s1145_s1  ;;  %p1151_p13 = scmp.lt.s32.totalorder %s1145_s1, %s1145_s1 }
  0x20   :  { %p1152_p0 = por %p1151_p13, %p1150_p12 }
  0x22   :  { %p1153_p1 = pnand %p1152_p0, %p1146_p11 }
  0x24   :  { %1156 = shalt.err (!%p1153_p1)
}
  0x25   :  { %s1282_s18 = smov 64   ;;  %s1283_s24 = smov 4  }
  0x26   :  { %70 = dma.hbm_to_vmem [thread:$0]  %s1496_s5, 1024, %s65_s13, [#allocation9], %s1282_s18, %s1282_s18, %s1283_s24  }
  0x27   :  { %s1157_s29 = scalar_lea.hbm %s1491_s0, 256 }
  0x28   :  { %p1158_p2 = scmp.ne.s32.totalorder %s1491_s0, %s1157_s29  ;;  %p1161_p3 = scmp.lt.u32.totalorder %s1157_s29, %s1491_s0 }
  0x2a   :  { %p1163_p4 = pnand %p1161_p3, %p1158_p2 }
  0x2c   :  { %1166 = shalt.err (!%p1163_p4)
}
  0x2d   :  { %s1167_s17 = scalar_lea.vmem %s28_s15, 256  ;;  %p1172_p6 = scmp.lt.s32.totalorder %s28_s15, %s28_s15 }
  0x2e   :  { %p1168_p5 = scmp.ne.s32.totalorder %s28_s15, %s1167_s17  ;;  %p1173_p7 = scmp.lt.s32.totalorder %s1167_s17, %s1167_s17 }
  0x30   :  { %p1174_p8 = por %p1173_p7, %p1172_p6 }
  0x32   :  { %p1175_p9 = pnand %p1174_p8, %p1168_p5 }
  0x34   :  { %1178 = shalt.err (!%p1175_p9)
}
  0x35   :  { %30 = dma.hbm_to_vmem [thread:$0]  %s1491_s0, 256, %s28_s15, [#allocation3]  }
  0x36   :  { %s1284_s19 = smov [#allocation7]   ;;  %s1285_s21 = smov [#allocation10]  }
  0x37   :  { %s50_s20 = sshll.u32 %s1284_s19, 4  ;;  %s78_s22 = sshll.u32 %s1285_s21, 4  ;;  %s51_s20 = int_to_ptr.vmem [resolvable:$true] %s50_s20  ;;  %s79_s22 = int_to_ptr.vmem [resolvable:$true] %s78_s22 }
  0x38   :  { %s1179_s25 = scalar_lea.hbm %s1494_s3, 2048 }
  0x39   :  { %p1180_p10 = scmp.ne.s32.totalorder %s1494_s3, %s1179_s25  ;;  %p1183_p11 = scmp.lt.u32.totalorder %s1179_s25, %s1494_s3 }
  0x3b   :  { %p1185_p12 = pnand %p1183_p11, %p1180_p10 }
  0x3d   :  { %1188 = shalt.err (!%p1185_p12)
}
  0x3e   :  { %s1189_s0 = scalar_lea.vmem %s51_s20, 2048  ;;  %p1194_p0 = scmp.lt.s32.totalorder %s51_s20, %s51_s20 }
  0x3f   :  { %p1190_p13 = scmp.ne.s32.totalorder %s51_s20, %s1189_s0  ;;  %p1195_p1 = scmp.lt.s32.totalorder %s1189_s0, %s1189_s0 }
  0x41   :  { %p1196_p2 = por %p1195_p1, %p1194_p0 }
  0x43   :  { %p1197_p3 = pnand %p1196_p2, %p1190_p13 }
  0x45   :  { %1200 = shalt.err (!%p1197_p3)
}
  0x46   :  { %56 = dma.hbm_to_vmem [thread:$0]  %s1494_s3, 2048, %s51_s20, [#allocation6], %s1282_s18, %s1282_s18, %s1283_s24  }
  0x47   :  { %s1201_s16 = scalar_lea.hbm %s1498_s7, 1024 }
  0x48   :  { %p1202_p4 = scmp.ne.s32.totalorder %s1498_s7, %s1201_s16  ;;  %p1205_p5 = scmp.lt.u32.totalorder %s1201_s16, %s1498_s7 }
  0x4a   :  { %p1207_p6 = pnand %p1205_p5, %p1202_p4 }
  0x4c   :  { %1210 = shalt.err (!%p1207_p6)
}
  0x4d   :  { %s1211_s21 = scalar_lea.vmem %s79_s22, 1024  ;;  %p1216_p8 = scmp.lt.s32.totalorder %s79_s22, %s79_s22 }
  0x4e   :  { %p1212_p7 = scmp.ne.s32.totalorder %s79_s22, %s1211_s21  ;;  %p1217_p9 = scmp.lt.s32.totalorder %s1211_s21, %s1211_s21 }
  0x50   :  { %p1218_p10 = por %p1217_p9, %p1216_p8 }
  0x52   :  { %p1219_p11 = pnand %p1218_p10, %p1212_p7 }
  0x54   :  { %1222 = shalt.err (!%p1219_p11)
}
  0x55   :  { %84 = dma.hbm_to_vmem [thread:$0]  %s1498_s7, 1024, %s79_s22, [#allocation9], %s1282_s18, %s1282_s18, %s1283_s24  }
  0x56   :  { %s1286_s23 = smov [#allocation11]   ;;  %s1223_s27 = scalar_lea.hbm %s1500_s9, 1024 }
  0x57   :  { %s92_s1 = sshll.u32 %s1286_s23, 4  ;;  %p1224_p12 = scmp.ne.s32.totalorder %s1500_s9, %s1223_s27  ;;  %s93_s1 = int_to_ptr.vmem [resolvable:$true] %s92_s1 }
  0x58   :  { %p1227_p13 = scmp.lt.u32.totalorder %s1223_s27, %s1500_s9 }
  0x5a   :  { %p1229_p0 = pnand %p1227_p13, %p1224_p12 }
  0x5c   :  { %1232 = shalt.err (!%p1229_p0)
}
  0x5d   :  { %s1233_s30 = scalar_lea.vmem %s93_s1, 1024  ;;  %p1238_p2 = scmp.lt.s32.totalorder %s93_s1, %s93_s1 }
  0x5e   :  { %p1234_p1 = scmp.ne.s32.totalorder %s93_s1, %s1233_s30  ;;  %p1239_p3 = scmp.lt.s32.totalorder %s1233_s30, %s1233_s30 }
  0x60   :  { %p1240_p4 = por %p1239_p3, %p1238_p2 }
  0x62   :  { %p1241_p5 = pnand %p1240_p4, %p1234_p1 }
  0x64   :  { %1244 = shalt.err (!%p1241_p5)
}
  0x65   :  { %98 = dma.hbm_to_vmem [thread:$0]  %s1500_s9, 1024, %s93_s1, [#allocation12], %s1282_s18, %s1282_s18, %s1283_s24  }
  0x66   :  { %1267 = dma.done.wait [#allocation3], 256  }
  0x67   :  { %1268 = vsyncadd [#allocation3], 4294967040 }
  0x68   :  { %1269 = dma.done.wait [#allocation6], 4864  }
  0x69   :  { %1270 = vsyncadd [#allocation6], 4294962432 }
  0x6a   :  { %1271 = dma.done.wait [#allocation9], 2048  }
  0x6b   :  { %1272 = vsyncadd [#allocation9], 4294965248 }
  0x6c   :  { %1273 = dma.done.wait [#allocation12], 1024  }
  0x6d   :  { %1274 = vsyncadd [#allocation12], 4294966272  ;;  %v1040_v0 = vld [vmem:[#allocation5 + $0x4] ss:$8 sps:$4 sm:$0xff]   ;;  %v1042_v1 = vld [vmem:[#allocation5] ss:$8 sps:$4 sm:$0xff]   ;;  %v148_v43 = vlaneseq }
  0x6e   :  { %272 = vmatprep.subr.bf16.mxu0 %v1040_v0  ;;  %v1043_v2 = vld [vmem:[#allocation5 + $0x14] ss:$8 sps:$4 sm:$0xff]   ;;  %v1045_v3 = vld [vmem:[#allocation5 + $0x10] ss:$8 sps:$4 sm:$0xff]   ;;  %v1046_v4 = vld [vmem:[#allocation5 + $0x24] ss:$8 sps:$4 sm:$0xff]  }
  0x6f   :  { %273 = vmatpush1.bf16.msra.mxu0 %v1042_v1  ;;  %v1048_v5 = vld [vmem:[#allocation5 + $0x20] ss:$8 sps:$4 sm:$0xff]   ;;  %v1049_v6 = vld [vmem:[#allocation5 + $0x34] ss:$8 sps:$4 sm:$0xff]   ;;  %v1051_v7 = vld [vmem:[#allocation5 + $0x30] ss:$8 sps:$4 sm:$0xff]  }
  0x70   :  { %274 = vmatprep.subr.bf16.mxu0 %v1043_v2  ;;  %v1052_v8 = vld [vmem:[#allocation5 + $0x44] ss:$8 sps:$4 sm:$0xff]   ;;  %v1054_v9 = vld [vmem:[#allocation5 + $0x40] ss:$8 sps:$4 sm:$0xff]   ;;  %v121_v10 = vld [vmem:[#allocation2 + $0x8] sm:$0xff]  ;;  %vm268_vm0 = vcmask 392192  }
  0x71   :  { %v1055_v11 = vld [vmem:[#allocation5 + $0x54] ss:$8 sps:$4 sm:$0xff]   ;;  %v123_v12 = vpack.c.bf16 %v121_v10, %v121_v10  ;;  %v1057_v14 = vld [vmem:[#allocation5 + $0x50] ss:$8 sps:$4 sm:$0xff]   ;;  %v1058_v16 = vld [vmem:[#allocation5 + $0x64] ss:$8 sps:$4 sm:$0xff]  }
  0x72   :  { %v1073_v13 = vld [vmem:[#allocation7 + $0x40] sm:$0xff]   ;;  %v1075_v17 = vld [vmem:[#allocation7 + $0x48] sm:$0xff]   ;;  %v1077_v19 = vld [vmem:[#allocation7 + $0x50] sm:$0xff]   ;;  %v1287_v42 = vmov 0.0   ;;  %v149_v44 = vshrl.u32 %v148_v43, 7  ;;  %vm1288_vm1 = vmmov 0  }
  0x73   :  { %275 = vmatpush1.bf16.msra.mxu0 %v1045_v3  ;;  %873 = vmatprep.mubr.msk.bf16.mxu0 %vm268_vm0, %v123_v12  ;;  %v1074_v15 = vld [vmem:[#allocation7] sm:$0xff]   ;;  %v1076_v18 = vld [vmem:[#allocation7 + $0x8] sm:$0xff]   ;;  %v1060_v20 = vld [vmem:[#allocation5 + $0x60] ss:$8 sps:$4 sm:$0xff]   ;;  %s1289_s5 = smov [#allocation13]  }
  0x74   :  { %276 = vmatprep.subr.bf16.mxu0 %v1046_v4  ;;  %918 = vmatprep.subr.bf16.mxu1 %v1073_v13  ;;  %v1061_v21 = vld [vmem:[#allocation5 + $0x74] ss:$8 sps:$4 sm:$0xff]   ;;  %v1078_v22 = vld [vmem:[#allocation7 + $0x10] sm:$0xff]   ;;  %v1079_v23 = vld [vmem:[#allocation7 + $0x58] sm:$0xff]   ;;  %v150_v45 = vsub.s32 0, %v149_v44  ;;  %v154_v47 = vsub.s32 1, %v149_v44 }
  0x75   :  { %919 = vmatpush3.bf16.msra.mxu1 %v1074_v15  ;;  %v1063_v24 = vld [vmem:[#allocation5 + $0x70] ss:$8 sps:$4 sm:$0xff]   ;;  %v1064_v25 = vld [vmem:[#allocation5 + $0x84] ss:$8 sps:$4 sm:$0xff]   ;;  %v1066_v28 = vld [vmem:[#allocation5 + $0x80] ss:$8 sps:$4 sm:$0xff]  }
  0x76   :  { %920 = vmatprep.subr.bf16.mxu1 %v1075_v17  ;;  %v1080_v26 = vld [vmem:[#allocation7 + $0x18] sm:$0xff]   ;;  %v1081_v27 = vld [vmem:[#allocation7 + $0x60] sm:$0xff]   ;;  %v1083_v31 = vld [vmem:[#allocation7 + $0x68] sm:$0xff]   ;;  %s839_s13 = sshll.u32 %s1289_s5, 4  ;;  %s840_s13 = int_to_ptr.vmem [resolvable:$true] %s839_s13 }
  0x77   :  { %277 = vmatpush1.bf16.msra.mxu0 %v1048_v5  ;;  %v1082_v29 = vld [vmem:[#allocation7 + $0x20] sm:$0xff]   ;;  %v1084_v33 = vld [vmem:[#allocation7 + $0x28] sm:$0xff]   ;;  %v1070_v34 = vld [vmem:[#allocation5 + $0xa4] ss:$8 sps:$4 sm:$0xff]   ;;  %p1250_p7 = scmp.lt.s32.totalorder %s840_s13, %s840_s13 }
  0x78   :  { %278 = vmatprep.subr.bf16.mxu0 %v1049_v6  ;;  %v1067_v30 = vld [vmem:[#allocation5 + $0x94] ss:$8 sps:$4 sm:$0xff]   ;;  %v1069_v32 = vld [vmem:[#allocation5 + $0x90] ss:$8 sps:$4 sm:$0xff]   ;;  %v1072_v35 = vld [vmem:[#allocation5 + $0xa0] ss:$8 sps:$4 sm:$0xff]  }
  0x79   :  { %921 = vmatpush3.bf16.msra.mxu1 %v1076_v18  ;;  %v120_v36 = vld [vmem:[#allocation2] sm:$0xff]  ;;  %v1085_v38 = vld [vmem:[#allocation7 + $0x70] sm:$0xff]   ;;  %v1087_v40 = vld [vmem:[#allocation7 + $0x78] sm:$0xff]  }
  0x7a   :  { %922 = vmatprep.subr.bf16.mxu1 %v1077_v19  ;;  %v122_v37 = vpack.c.bf16 %v120_v36, %v120_v36  ;;  %v1086_v39 = vld [vmem:[#allocation7 + $0x30] sm:$0xff]   ;;  %v1088_v41 = vld [vmem:[#allocation7 + $0x38] sm:$0xff]   ;;  %v146_v46 = vld [vmem:[%s1493_s2] sm:$0x3] }
  0x7b   :  { %279 = vmatpush1.bf16.msra.mxu0 %v1051_v7  ;;  %v151_v48 = vrot.slane %v146_v46, %v150_v45  ;;  %v155_v49 = vrot.slane %v146_v46, %v154_v47  ;;  %v1089_v59 = vld [vmem:[#allocation8] sm:$0xff]   ;;  %v1090_v61 = vld [vmem:[#allocation8 + $0x8] sm:$0xff]   ;;  %v1091_v62 = vld [vmem:[#allocation8 + $0x10] sm:$0xff]  }
  0x7c   :  { %280 = vmatprep.subr.bf16.mxu0 %v1052_v8  ;;  %v1092_v63 = vld [vmem:[#allocation8 + $0x18] sm:$0xff]   ;;  %v1093_v0 = vld [vmem:[#allocation8 + $0x20] sm:$0xff]   ;;  %v1094_v1 = vld [vmem:[#allocation8 + $0x28] sm:$0xff]  }
  0x7d   :  { %923 = vmatpush3.bf16.msra.mxu1 %v1078_v22  ;;  %v1095_v2 = vld [vmem:[#allocation8 + $0x30] sm:$0xff]   ;;  %v1096_v3 = vld [vmem:[#allocation8 + $0x38] sm:$0xff]   ;;  %v1097_v4 = vld [vmem:[#allocation10] sm:$0xff]  }
  0x7e   :  { %924 = vmatprep.subr.bf16.mxu1 %v1079_v23  ;;  %v1098_v5 = vld [vmem:[#allocation10 + $0x8] sm:$0xff]   ;;  %v1099_v6 = vld [vmem:[#allocation10 + $0x10] sm:$0xff]   ;;  %v1100_v7 = vld [vmem:[#allocation10 + $0x18] sm:$0xff]  }
  0x7f   :  { %281 = vmatpush1.bf16.msra.mxu0 %v1054_v9  ;;  %v1101_v8 = vld [vmem:[#allocation10 + $0x20] sm:$0xff]   ;;  %v1102_v9 = vld [vmem:[#allocation10 + $0x28] sm:$0xff]   ;;  %v1103_v19 = vld [vmem:[#allocation10 + $0x30] sm:$0xff]  }
  0x80   :  { %282 = vmatprep.subr.bf16.mxu0 %v1055_v11  ;;  %v874_v11 = vld [vmem:[%s1495_s4] ss:$0 sm:$0xff]  ;;  %v1106_v22 = vld [vmem:[#allocation11 + $0x8] sm:$0xff]   ;;  %v1107_v23 = vld [vmem:[#allocation11 + $0x10] sm:$0xff]  }
  0x81   :  { %925 = vmatpush3.bf16.msra.mxu1 %v1080_v26  ;;  %v1110_v26 = vld [vmem:[#allocation11 + $0x28] sm:$0xff]   ;;  %v1112_v36 = vld [vmem:[#allocation11 + $0x38] sm:$0xff]   ;;  %v909_v46 = vld [vmem:[%s1501_s10] ss:$0 sm:$0xff] }
  0x82   :  { %926 = vmatprep.subr.bf16.mxu1 %v1081_v27  ;;  %v891_v27 = vld [vmem:[%s1497_s6] ss:$0 sm:$0xff] }
  0x83   :  { %283 = vmatpush1.bf16.msra.mxu0 %v1057_v14 }
  0x84   :  { %284 = vmatprep.subr.bf16.mxu0 %v1058_v16 }
  0x85   :  { %927 = vmatpush3.bf16.msra.mxu1 %v1082_v29 }
  0x86   :  { %928 = vmatprep.subr.bf16.mxu1 %v1083_v31 }
  0x87   :  { %285 = vmatpush1.bf16.msra.mxu0 %v1060_v20  ;;  %v1104_v20 = vld [vmem:[#allocation10 + $0x38] sm:$0xff]  }
  0x88   :  { %286 = vmatprep.subr.bf16.mxu0 %v1061_v21  ;;  %v1105_v21 = vld [vmem:[#allocation11] sm:$0xff]  }
  0x89   :  { %929 = vmatpush3.bf16.msra.mxu1 %v1084_v33 }
  0x8a   :  { %930 = vmatprep.subr.bf16.mxu1 %v1085_v38 }
  0x8b   :  { %287 = vmatpush1.bf16.msra.mxu0 %v1063_v24  ;;  %v1108_v24 = vld [vmem:[#allocation11 + $0x18] sm:$0xff]  }
  0x8c   :  { %288 = vmatprep.subr.bf16.mxu0 %v1064_v25  ;;  %v1109_v25 = vld [vmem:[#allocation11 + $0x20] sm:$0xff]  }
  0x8d   :  { %931 = vmatpush3.bf16.msra.mxu1 %v1086_v39 }
  0x8e   :  { %932 = vmatprep.subr.bf16.mxu1 %v1087_v40 }
  0x8f   :  { %289 = vmatpush1.bf16.msra.mxu0 %v1066_v28 }
  0x90   :  { %290 = vmatprep.subr.bf16.mxu0 %v1067_v30 }
  0x91   :  { %933 = vmatpush3.bf16.msra.mxu1 %v1088_v41 }
  0x92   :  { %967 = vmatprep.subr.bf16.mxu1 %v1287_v42 }
  0x93   :  { %291 = vmatpush1.bf16.msra.mxu0 %v1069_v32 }
  0x94   :  { %292 = vmatprep.subr.bf16.mxu0 %v1070_v34 }
  0x97   :  { %293 = vmatpush1.bf16.msra.mxu0 %v1072_v35  ;;  %v1111_v35 = vld [vmem:[#allocation11 + $0x30] sm:$0xff]  }
  0x98   :  { %987 = vmatprep.subr.bf16.mxu0 %v1287_v42 }
  0x9a   :  { %305 = vmatmul.mubr.bf16.vlgmr.msra.gmra.mrb[0].mxu0 %v122_v37  ;;  %v900_v37 = vld [vmem:[%s1499_s8] ss:$0 sm:$0xff]  ;;  %s1245_s8 = scalar_lea.vmem %s840_s13, 64 }
  0x9b   :  { %1003 = vmatprep.mubr.msk.bf16.mxu0 %vm1288_vm1, %v1287_v42  ;;  %988 = vmatpush3.bf16.msra.mxu0 %v1097_v4  ;;  %p1246_p6 = scmp.ne.s32.totalorder %s840_s13, %s1245_s8  ;;  %p1251_p8 = scmp.lt.s32.totalorder %s1245_s8, %s1245_s8 }
  0x9c   :  { %989 = vmatprep.subr.bf16.mxu0 %v1287_v42 }
  0x9d   :  { %p1252_p9 = por %p1251_p8, %p1250_p7 }
  0x9f   :  { %990 = vmatpush3.bf16.msra.mxu0 %v1098_v5  ;;  %p1253_p10 = pnand %p1252_p9, %p1246_p6 }
  0xa0   :  { %991 = vmatprep.subr.bf16.mxu0 %v1287_v42 }
  0xa3   :  { %992 = vmatpush3.bf16.msra.mxu0 %v1099_v6 }
  0xa4   :  { %993 = vmatprep.subr.bf16.mxu0 %v1287_v42 }
  0xa7   :  { %994 = vmatpush3.bf16.msra.mxu0 %v1100_v7 }
  0xa8   :  { %995 = vmatprep.subr.bf16.mxu0 %v1287_v42 }
  0xab   :  { %996 = vmatpush3.bf16.msra.mxu0 %v1101_v8 }
  0xac   :  { %997 = vmatprep.subr.bf16.mxu0 %v1287_v42 }
  0xaf   :  { %998 = vmatpush3.bf16.msra.mxu0 %v1102_v9 }
  0xb0   :  { %999 = vmatprep.subr.bf16.mxu0 %v1287_v42 }
  0xb3   :  { %1000 = vmatpush3.bf16.msra.mxu0 %v1103_v19 }
  0xb4   :  { %1001 = vmatprep.subr.bf16.mxu0 %v1287_v42 }
  0xb7   :  { %1002 = vmatpush3.bf16.msra.mxu0 %v1104_v20 }
 0x16d   :  { %v306_v50 = vpop.f32.mrb[0].mxu0 }
 0x16e   :  { %v307_v51 = vadd.f32 %v306_v50, %v151_v48  ;;  %v308_v52 = vpop.f32.mrb[1].mxu0 }
 0x16f   :  { %v309_v53 = vadd.f32 %v308_v52, %v155_v49  ;;  %v310_v54 = vpop.f32.mrb[2].mxu0 }
 0x170   :  { %v313_v55 = vmax.f32 %v307_v51, 0.0  ;;  %v311_v56 = vpop.f32.mrb[3].mxu0 }
 0x171   :  { %v314_v57 = vmax.f32 %v309_v53, 0.0 }
 0x172   :  { %v315_v60 = vpack.c.bf16 %v313_v55, %v313_v55 }
 0x173   :  { %v316_v58 = vpack.c.bf16 %v314_v57, %v314_v57 }
 0x175   :  { %484 = vmatprep.mubr.bf16.mxu1 %v316_v58 }
 0x176   :  { %485 = vmatmul.mubr.bf16.vlgmr.msra.gmra.mrb[0].mxu1 %v315_v60 }
 0x177   :  { %968 = vmatpush3.bf16.msra.mxu1 %v1089_v59  ;;  %983 = vmatprep.mubr.msk.bf16.mxu1 %vm1288_vm1, %v1287_v42 }
 0x178   :  { %969 = vmatprep.subr.bf16.mxu1 %v1287_v42 }
 0x17b   :  { %970 = vmatpush3.bf16.msra.mxu1 %v1090_v61 }
 0x17c   :  { %971 = vmatprep.subr.bf16.mxu1 %v1287_v42 }
 0x17f   :  { %972 = vmatpush3.bf16.msra.mxu1 %v1091_v62 }
 0x180   :  { %973 = vmatprep.subr.bf16.mxu1 %v1287_v42 }
 0x183   :  { %974 = vmatpush3.bf16.msra.mxu1 %v1092_v63 }
 0x184   :  { %975 = vmatprep.subr.bf16.mxu1 %v1287_v42 }
 0x187   :  { %976 = vmatpush3.bf16.msra.mxu1 %v1093_v0 }
 0x188   :  { %977 = vmatprep.subr.bf16.mxu1 %v1287_v42 }
 0x18b   :  { %978 = vmatpush3.bf16.msra.mxu1 %v1094_v1 }
 0x18c   :  { %979 = vmatprep.subr.bf16.mxu1 %v1287_v42 }
 0x18f   :  { %980 = vmatpush3.bf16.msra.mxu1 %v1095_v2 }
 0x190   :  { %981 = vmatprep.subr.bf16.mxu1 %v1287_v42 }
 0x193   :  { %982 = vmatpush3.bf16.msra.mxu1 %v1096_v3 }
 0x194   :  { %1007 = vmatprep.subr.bf16.mxu1 %v1287_v42 }
 0x249   :  { %v934_v10 = vpop.f32.mrb[0].mxu1 }
 0x24a   :  { %v935_v12 = vpop.f32.mrb[1].mxu1 }
 0x24b   :  { %v936_v13 = vadd.f32 %v935_v12, %v934_v10  ;;  %v937_v14 = vpop.f32.mrb[2].mxu1 }
 0x24c   :  { %v938_v15 = vpop.f32.mrb[3].mxu1 }
 0x24d   :  { %v487_v16 = vadd.f32 %v936_v13, %v874_v11 }
 0x24f   :  { %v492_v17 = vmax.f32 %v487_v16, 0.0 }
 0x251   :  { %v493_v18 = vpack.c.bf16 %v492_v17, %v492_v17 }
 0x253   :  { %984 = vmatmul.mubr.bf16.vlgmr.msra.gmra.mrb[4].mxu1 %v493_v18 }
 0x254   :  { %1023 = vmatprep.mubr.msk.bf16.mxu1 %vm1288_vm1, %v1287_v42  ;;  %1008 = vmatpush3.bf16.msra.mxu1 %v1105_v21 }
 0x255   :  { %1009 = vmatprep.subr.bf16.mxu1 %v1287_v42 }
 0x258   :  { %1010 = vmatpush3.bf16.msra.mxu1 %v1106_v22 }
 0x259   :  { %1011 = vmatprep.subr.bf16.mxu1 %v1287_v42 }
 0x25c   :  { %1012 = vmatpush3.bf16.msra.mxu1 %v1107_v23 }
 0x25d   :  { %1013 = vmatprep.subr.bf16.mxu1 %v1287_v42 }
 0x260   :  { %1014 = vmatpush3.bf16.msra.mxu1 %v1108_v24 }
 0x261   :  { %1015 = vmatprep.subr.bf16.mxu1 %v1287_v42 }
 0x264   :  { %1016 = vmatpush3.bf16.msra.mxu1 %v1109_v25 }
 0x265   :  { %1017 = vmatprep.subr.bf16.mxu1 %v1287_v42 }
 0x268   :  { %1018 = vmatpush3.bf16.msra.mxu1 %v1110_v26 }
 0x269   :  { %1019 = vmatprep.subr.bf16.mxu1 %v1287_v42 }
 0x26c   :  { %1020 = vmatpush3.bf16.msra.mxu1 %v1111_v35 }
 0x26d   :  { %1021 = vmatprep.subr.bf16.mxu1 %v1287_v42 }
 0x270   :  { %1022 = vmatpush3.bf16.msra.mxu1 %v1112_v36 }
 0x326   :  { %v599_v28 = vpop.f32.mrb[4].mxu1 }
 0x327   :  { %v600_v29 = vadd.f32 %v891_v27, %v599_v28  ;;  %v985_v30 = vpop.f32.mrb[5].mxu1 }
 0x328   :  { %v602_v31 = vpop.f32.mrb[6].mxu1 }
 0x329   :  { %v605_v32 = vmax.f32 %v600_v29, 0.0  ;;  %v986_v33 = vpop.f32.mrb[7].mxu1 }
 0x32b   :  { %v606_v34 = vpack.c.bf16 %v605_v32, %v605_v32 }
 0x32d   :  { %1004 = vmatmul.mubr.bf16.vlgmr.msra.gmra.mrb[4].mxu0 %v606_v34 }
 0x400   :  { %v712_v38 = vpop.f32.mrb[4].mxu0 }
 0x401   :  { %v713_v39 = vadd.f32 %v900_v37, %v712_v38  ;;  %v1005_v40 = vpop.f32.mrb[5].mxu0 }
 0x402   :  { %v715_v41 = vpop.f32.mrb[6].mxu0 }
 0x403   :  { %v718_v43 = vmax.f32 %v713_v39, 0.0  ;;  %v1006_v44 = vpop.f32.mrb[7].mxu0 }
 0x405   :  { %v719_v45 = vpack.c.bf16 %v718_v43, %v718_v43 }
 0x407   :  { %1024 = vmatmul.mubr.bf16.vlgmr.msra.gmra.mrb[8].mxu1 %v719_v45 }
 0x4da   :  { %v825_v47 = vpop.f32.mrb[8].mxu1 }
 0x4db   :  { %v826_v42 = vadd.f32 %v909_v46, %v825_v47  ;;  %v1025_v48 = vpop.f32.mrb[9].mxu1 }
 0x4dc   :  { %v828_v49 = vpop.f32.mrb[10].mxu1 }
 0x4dd   :  { %v831_v50 = vpack.c.bf16 %v826_v42, %v826_v42  ;;  %v1026_v51 = vpop.f32.mrb[11].mxu1 }
 0x4df   :  { %832 = vst [vmem:[#allocation13] sm:$0xf] %v831_v50 }
 0x4e0   :  { %1256 = shalt.err (!%p1253_p10)
}
 0x4e1   :  { %s1257_s10 = scalar_lea.hbm %s1502_s11, 64 }
 0x4e2   :  { %p1258_p11 = scmp.ne.s32.totalorder %s1502_s11, %s1257_s10  ;;  %p1261_p12 = scmp.lt.u32.totalorder %s1257_s10, %s1502_s11 }
 0x4e4   :  { %p1263_p13 = pnand %p1261_p12, %p1258_p11 }
 0x4e6   :  { %1266 = shalt.err (!%p1263_p13)
}
 0x4e7   :  { %842 = dma.vmem_to_hbm [thread:$0]  %s840_s13, 64, %s1502_s11, [#allocation4]  }
 0x4e8   :  { %1275 = dma.done.wait [#allocation4], 64  }
 0x4e9   :  { %1276 = vsyncadd [#allocation4], 4294967232 }
 0x4ea   :  { %846 = vsyncpa [#allocation3], 1 }
 0x4eb   :  { %847 = vsyncpa [#allocation6], 1 }
 0x4ec   :  { %848 = vsyncpa [#allocation9], 1 }
 0x4ed   :  { %849 = vsyncpa [#allocation12], 1 }
 0x4ee   :  { %850 = vsyncpa [#allocation4], 1 }

</bundles_post_ra>
